<compile_context>
chip_gen: v7x
topology: tpu7x:2x2x1
jax: 0.10.0
libtpu: 0.0.40
codegen_flags: <defaults>
</compile_context>

<pallas_src>
import functools

import jax
import jax.numpy as jnp
from jax.experimental import pallas as pl
from jax.experimental.pallas import tpu as pltpu


def _round_up(x, m):
    return ((x + m - 1) // m) * m


def mlp_kernel(x_ref, w1_ref, b1_ref, w2_ref, b2_ref, o_ref):
    # x_ref:  (TILE_B, D) bf16     w1_ref: (D, H) f32   b1_ref: (1, H) f32
    # w2_ref: (1, H) f32           b2_ref: (1, 1) f32 in SMEM
    # o_ref:  (TILE_B, 1) f32
    x = x_ref[...]
    # fc1 on the MXU, f32 accumulation, then bias + ReLU on the VPU.
    h = jnp.dot(x, w1_ref[...], preferred_element_type=jnp.float32) + b1_ref[...]
    h = jnp.maximum(h, 0.0)
    # fc2: width-1 output -> VPU multiply + XLU lane reduction (keeps MXU free).
    b2 = b2_ref[0, 0]
    out = jnp.sum(h * w2_ref[...], axis=-1, keepdims=True) + b2
    o_ref[...] = out.astype(o_ref.dtype)


@functools.partial(jax.jit, static_argnames=("tile_b",))
def model1_forward(x, w1, b1, w2, b2, *, tile_b=1024):
    """Forward pass of Model1. x: (B, D) f32; returns (B, 1) f32."""
    B, D = x.shape
    H = w1.shape[1]

    # Stream activations in bf16 (x dominates HBM traffic; ~2x on mem-bound roofline).
    x_s = x.astype(jnp.bfloat16)

    # Batch tiling: multiple of 8 (f32 sublanes), capped so double-buffered
    # (TILE_B, D) bf16 tiles comfortably fit scoped VMEM on v7x (64 MiB phys / 32 MiB
    # scoped) as well as v5e/v6e.
    tile_b = min(int(tile_b), _round_up(B, 8))
    tile_b = _round_up(tile_b, 8)
    Bp = _round_up(B, tile_b)
    if Bp != B:
        x_s = jnp.pad(x_s, ((0, Bp - B), (0, 0)))

    w1 = w1.astype(jnp.float32)
    b1 = b1.reshape(1, H).astype(jnp.float32)
    w2_row = w2.reshape(1, H).astype(jnp.float32)   # (H,1) -> (1,H) for VPU broadcast
    b2_s = b2.reshape(1, 1).astype(jnp.float32)

    grid = (Bp // tile_b,)

    cost = pl.CostEstimate(
        flops=2 * Bp * D * H + 2 * Bp * H,
        transcendentals=0,
        bytes_accessed=Bp * D * 2 + Bp * 4 + D * H * 4 + 2 * H * 4 + 4,
    )

    out = pl.pallas_call(
        mlp_kernel,
        out_shape=jax.ShapeDtypeStruct((Bp, 1), jnp.float32),
        grid=grid,
        in_specs=[
            # x: tiled over batch, auto double-buffered HBM->VMEM pipeline.
            pl.BlockSpec((tile_b, D), lambda i: (i, 0)),
            # Weights/biases: constant index_map -> stay resident, not re-DMAed.
            pl.BlockSpec((D, H), lambda i: (0, 0)),
            pl.BlockSpec((1, H), lambda i: (0, 0)),
            pl.BlockSpec((1, H), lambda i: (0, 0)),
            # b2 scalar lives in SMEM.
            pl.BlockSpec(memory_space=pltpu.MemorySpace.SMEM),
        ],
        out_specs=pl.BlockSpec((tile_b, 1), lambda i: (i, 0)),
        compiler_params=pltpu.CompilerParams(
            dimension_semantics=("parallel",),   # v7x: shard batch grid over both TCs
        ),
        cost_estimate=cost,
    )(x_s, w1, b1, w2_row, b2_s)

    # TODO(synk): for very small D, a lane-dense (B/128, 128) output slab would avoid
    # masked width-1 stores; with D>=32 the write is ~3% of traffic, so skipped.
    return out[:B]


def init_params(key, input_dim, hidden=8, out_dim=1, dtype=jnp.float32):
    # Mimics nn.Linear's uniform(-1/sqrt(fan_in), 1/sqrt(fan_in)) init.
    k1, k2, k3, k4 = jax.random.split(key, 4)
    lim1 = 1.0 / (input_dim ** 0.5)
    lim2 = 1.0 / (hidden ** 0.5)
    w1 = jax.random.uniform(k1, (input_dim, hidden), dtype, -lim1, lim1)
    b1 = jax.random.uniform(k2, (1, hidden), dtype, -lim1, lim1)
    w2 = jax.random.uniform(k3, (hidden, out_dim), dtype, -lim2, lim2)
    b2 = jax.random.uniform(k4, (1, out_dim), dtype, -lim2, lim2)
    return w1, b1, w2, b2


if __name__ == "__main__":
    key = jax.random.PRNGKey(0)
    k_x, k_p = jax.random.split(key)

    batch, input_dim = 30, 32   # non-multiple-of-8 batch exercises pad/slice path
    x = jax.random.normal(k_x, (batch, input_dim), jnp.float32)
    w1, b1, w2, b2 = init_params(k_p, input_dim)

    out = model1_forward(x, w1, b1, w2, b2)
    out = jax.block_until_ready(out)

    # Pure-JAX f32 reference. The kernel streams x in bf16, so compare with a
    # tolerance that covers bf16 rounding of the activations.
    ref = jnp.maximum(x @ w1 + b1, 0.0) @ w2 + b2
    assert out.shape == (batch, 1), out.shape
    assert jnp.allclose(out, ref, atol=2e-2, rtol=2e-2), (
        float(jnp.max(jnp.abs(out - ref)))
    )

    print("KERNEL_OK")
</pallas_src>

<mosaic_0001>
module attributes {stable_mosaic.version = 11 : i64} {
  func.func @mlp_kernel(%arg0: i32, %arg1: memref<32x32xbf16, #tpu.memory_space<vmem>>, %arg2: memref<32x8xf32, #tpu.memory_space<vmem>>, %arg3: memref<1x8xf32, #tpu.memory_space<vmem>>, %arg4: memref<1x8xf32, #tpu.memory_space<vmem>>, %arg5: memref<1x1xf32, #tpu.memory_space<smem>>, %arg6: memref<32x1xf32, #tpu.memory_space<vmem>>) attributes {dimension_semantics = [#tpu.dimension_semantics<parallel>], iteration_bounds = array<i64: 1>, scalar_prefetch = 0 : i64, scratch_operands = 0 : i64, tpu.core_type = #tpu.core_type<tc>, window_params = [{transform_indices = @transform_0, window_bounds = array<i64: 32, 32>}, {pipeline_mode = #tpu.pipeline_mode<synchronous>, transform_indices = @transform_1, window_bounds = array<i64: 32, 8>}, {pipeline_mode = #tpu.pipeline_mode<synchronous>, transform_indices = @transform_2, window_bounds = array<i64: 1, 8>}, {pipeline_mode = #tpu.pipeline_mode<synchronous>, transform_indices = @transform_3, window_bounds = array<i64: 1, 8>}, {transform_indices = @transform_4, window_bounds = array<i64: 1, 1>}, {transform_indices = @transform_5, window_bounds = array<i64: 32, 1>}]} {
    %c0 = arith.constant 0 : index
    %c0_0 = arith.constant 0 : index
    %0 = vector.load %arg1[%c0, %c0_0] : memref<32x32xbf16, #tpu.memory_space<vmem>>, vector<32x32xbf16>
    %c0_1 = arith.constant 0 : index
    %c0_2 = arith.constant 0 : index
    %1 = vector.load %arg2[%c0_1, %c0_2] : memref<32x8xf32, #tpu.memory_space<vmem>>, vector<32x8xf32>
    %cst = arith.constant dense<0.000000e+00> : vector<32x8xf32>
    %2 = tpu.matmul %0, %1, %cst {dimension_numbers = #tpu.dot_dimension_numbers<[1], [0], [0], [1], [0, 0, 1, 1], [], []>} : vector<32x32xbf16>, vector<32x8xf32>, vector<32x8xf32> -> vector<32x8xf32>
    %c0_3 = arith.constant 0 : index
    %c0_4 = arith.constant 0 : index
    %3 = vector.load %arg3[%c0_3, %c0_4] : memref<1x8xf32, #tpu.memory_space<vmem>>, vector<1x8xf32>
    %4 = vector.broadcast %3 : vector<1x8xf32> to vector<32x8xf32>
    %5 = arith.addf %2, %4 : vector<32x8xf32>
    %cst_5 = arith.constant 0.000000e+00 : f32
    %6 = vector.broadcast %cst_5 : f32 to vector<32x8xf32>
    %7 = arith.maximumf %5, %6 : vector<32x8xf32>
    %c0_6 = arith.constant 0 : index
    %c0_7 = arith.constant 0 : index
    %8 = memref.load %arg5[%c0_6, %c0_7] : memref<1x1xf32, #tpu.memory_space<smem>>
    %c0_8 = arith.constant 0 : index
    %c0_9 = arith.constant 0 : index
    %9 = vector.load %arg4[%c0_8, %c0_9] : memref<1x8xf32, #tpu.memory_space<vmem>>, vector<1x8xf32>
    %10 = vector.broadcast %9 : vector<1x8xf32> to vector<32x8xf32>
    %11 = arith.mulf %7, %10 : vector<32x8xf32>
    %cst_10 = arith.constant dense<0.000000e+00> : vector<32xf32>
    %12 = vector.multi_reduction <add>, %11, %cst_10 [1] : vector<32x8xf32> to vector<32xf32>
    %13 = vector.shape_cast %12 : vector<32xf32> to vector<32x1xf32>
    %14 = vector.broadcast %8 : f32 to vector<32x1xf32>
    %15 = arith.addf %13, %14 : vector<32x1xf32>
    %c0_11 = arith.constant 0 : index
    %c0_12 = arith.constant 0 : index
    %16 = vector.load %arg6[%c0_11, %c0_12] : memref<32x1xf32, #tpu.memory_space<vmem>>, vector<32x1xf32>
    tpu.vector_store %arg6[%c0_11, %c0_12], %15 {strides = array<i32>} : memref<32x1xf32, #tpu.memory_space<vmem>>, vector<32x1xf32>,
    return
  }
  func.func @transform_0(%arg0: i32) -> (i32, i32) {
    %c0_i32 = arith.constant 0 : i32
    %c0_i32_0 = arith.constant 0 : i32
    return %arg0, %c0_i32 : i32, i32
  }
  func.func @transform_1(%arg0: i32) -> (i32, i32) {
    %c0_i32 = arith.constant 0 : i32
    %c0_i32_0 = arith.constant 0 : i32
    %c0_i32_1 = arith.constant 0 : i32
    return %c0_i32, %c0_i32_0 : i32, i32
  }
  func.func @transform_2(%arg0: i32) -> (i32, i32) {
    %c0_i32 = arith.constant 0 : i32
    %c0_i32_0 = arith.constant 0 : i32
    %c0_i32_1 = arith.constant 0 : i32
    return %c0_i32, %c0_i32_0 : i32, i32
  }
  func.func @transform_3(%arg0: i32) -> (i32, i32) {
    %c0_i32 = arith.constant 0 : i32
    %c0_i32_0 = arith.constant 0 : i32
    %c0_i32_1 = arith.constant 0 : i32
    return %c0_i32, %c0_i32_0 : i32, i32
  }
  func.func @transform_4(%arg0: i32) -> (i32, i32) {
    %c0_i32 = arith.constant 0 : i32
    %c0_i32_0 = arith.constant 0 : i32
    %c0_i32_1 = arith.constant 0 : i32
    return %c0_i32, %c0_i32_0 : i32, i32
  }
  func.func @transform_5(%arg0: i32) -> (i32, i32) {
    %c0_i32 = arith.constant 0 : i32
    %c0_i32_0 = arith.constant 0 : i32
    return %arg0, %c0_i32 : i32, i32
  }
}

</mosaic_0001>

<bundles_post_ra>
// kernel: model1_forward.1
= control target key start
LH: loop header
LB: loop body
LE: loop exit
PB: predicated region body
PF: predicated region fallthrough
CT: control target
= control target key end

     0   :  { %vm47_vm0 = vcmask 261120   ;;  %vm151_vm1 = vcmask 64512   ;;  %vm169_vm2 = vcmask 7168   ;;  %s281_s1 = inlined_call_operand.vmem [shape: f32[32,8], index: 1, kind: input, shape index: {}]   ;;  %s282_s0 = inlined_call_operand.vmem [shape: bf16[32,32], index: 0, kind: input, shape index: {}]   ;;  %s283_s2 = inlined_call_operand.vmem [shape: f32[1,8], index: 2, kind: input, shape index: {}]   ;;  %s284_s3 = inlined_call_operand.vmem [shape: f32[1,8], index: 3, kind: input, shape index: {}]   ;;  %s285_s4 = inlined_call_operand.<no memory space> [shape: f32[1,1], index: 4, kind: input, shape index: {}]   ;;  %s286_s5 = inlined_call_operand.vmem [shape: f32[32,1], index: 5, kind: output, shape index: {}]  }
   0x1   :  { %v26_v0 = vld [vmem:[%s281_s1] sm:$0xff]  ;;  %v27_v1 = vld [vmem:[%s281_s1 + $0x8] sm:$0xff]  ;;  %v28_v2 = vld [vmem:[%s281_s1 + $0x10] sm:$0xff]  ;;  %v164_v30 = vstv %s285_s4 }
   0x2   :  { %v202_v3 = vpack.c.bf16 %v27_v1, %v26_v0  ;;  %v29_v4 = vld [vmem:[%s281_s1 + $0x18] sm:$0xff]  ;;  %v210_v6 = vld [vmem:[%s282_s0] sm:$0xff]   ;;  %v211_v7 = vld [vmem:[%s282_s0 + $0x8] sm:$0xff]  }
   0x3   :  { %v206_v5 = vpack.c.bf16 %v29_v4, %v28_v2  ;;  %198 = vmatprep.mubr.msk.bf16.mxu0 %vm47_vm0, %v210_v6  ;;  %v178_v8 = vld [vmem:[%s283_s2] ss:$0 sm:$0xff] }
   0x4   :  { %203 = vmatprep.subr.bf16.mxu0 %v202_v3  ;;  %v183_v14 = vld [vmem:[%s284_s3] ss:$0 sm:$0xff] }
   0x5   :  { %205 = vmatpush3.bf16.msra.mxu0 %v202_v3 }
   0x6   :  { %207 = vmatprep.subr.bf16.mxu0 %v206_v5 }
   0x9   :  { %209 = vmatpush3.bf16.msra.mxu0 %v206_v5 }
   0xc   :  { %199 = vmatmul.mubr.msk.bf16.vlgmr.msra.gmra.mrb[0].mxu0 %vm47_vm0, %v211_v7 }
  0xdf   :  { %v200_v9 = vpop.f32.mrb[0].mxu0 }
  0xe0   :  { %v129_v10 = vadd.f32 %v200_v9, %v178_v8  ;;  %v120_v11 = vpop.f32.mrb[1].mxu0 }
  0xe1   :  { %v121_v12 = vadd.f32 %v178_v8, %v120_v11  ;;  %v201_v13 = vpop.f32.mrb[2].mxu0 }
  0xe2   :  { %v137_v15 = vmax.f32 %v129_v10, 0.0  ;;  %v132_v16 = vadd.f32 %v201_v13, %v178_v8  ;;  %v123_v17 = vpop.f32.mrb[3].mxu0 }
  0xe3   :  { %v135_v18 = vmax.f32 %v121_v12, 0.0  ;;  %v124_v19 = vadd.f32 %v178_v8, %v123_v17 }
  0xe4   :  { %v138_v20 = vmax.f32 %v132_v16, 0.0  ;;  %v149_v21 = vmul.f32 %v183_v14, %v137_v15 }
  0xe5   :  { %v136_v22 = vmax.f32 %v124_v19, 0.0  ;;  %v147_v23 = vmul.f32 %v183_v14, %v135_v18 }
  0xe6   :  { %v158_v24 = vsel %vm151_vm1, %v149_v21, 0.0  ;;  %v150_v25 = vmul.f32 %v183_v14, %v138_v20 }
  0xe7   :  { %159 = vadd.xlane.f32.xlu1 %v158_v24  ;;  %v152_v26 = vsel %vm151_vm1, %v147_v23, 0.0  ;;  %v148_v27 = vmul.f32 %v183_v14, %v136_v22 }
  0xe8   :  { %153 = vadd.xlane.f32.xlu0 %v152_v26  ;;  %v161_v28 = vsel %vm151_vm1, %v150_v25, 0.0 }
  0xe9   :  { %v155_v29 = vsel %vm151_vm1, %v148_v27, 0.0 }
  0xeb   :  { %162 = vadd.xlane.f32.xlu1 %v161_v28 }
  0xec   :  { %156 = vadd.xlane.f32.xlu0 %v155_v29 }
 0x174   :  { %v160_v31 = vpop.xlane.xlu1 %159 }
 0x175   :  { %v167_v32 = vadd.f32 %v164_v30, %v160_v31  ;;  %v154_v33 = vpop.xlane.xlu0 %153 }
 0x176   :  { %v165_v34 = vadd.f32 %v164_v30, %v154_v33 }
 0x177   :  { %172 = vst.msk [vmem:[%s286_s5 + $0x10] sm:$0xff] %vm169_vm2, %v167_v32 }
 0x178   :  { %170 = vst.msk [vmem:[%s286_s5] sm:$0xff] %vm169_vm2, %v165_v34  ;;  %v163_v35 = vpop.xlane.xlu1 %162 }
 0x179   :  { %v168_v36 = vadd.f32 %v164_v30, %v163_v35  ;;  %v157_v37 = vpop.xlane.xlu0 %156 }
 0x17a   :  { %v166_v38 = vadd.f32 %v164_v30, %v157_v37 }
 0x17b   :  { %173 = vst.msk [vmem:[%s286_s5 + $0x18] sm:$0xff] %vm169_vm2, %v168_v36 }
 0x17c   :  { %171 = vst.msk [vmem:[%s286_s5 + $0x8] sm:$0xff] %vm169_vm2, %v166_v38 }

</bundles_post_ra>
